<compile_context>
chip_gen: v5e
topology: v5e:2x2
jax: 0.10.0
libtpu: 0.0.40
codegen_flags: <defaults>
</compile_context>

<pallas_src>
import functools

import jax
import jax.numpy as jnp
from jax import lax
from jax.experimental import pallas as pl
from jax.experimental.pallas import tpu as pltpu

_MiB = 1024 * 1024


def _local_inference_kernel(p_ref, h_ref, mp_ref, mh_ref, *, matmul_dtype):
    # p_ref: (Bt, Lp, H), h_ref: (Bt, Lh, H) -- native input dtype.
    p = p_ref[...]
    h = h_ref[...]
    H = p.shape[-1]
    odt = mp_ref.dtype
    mdt = p.dtype if matmul_dtype is None else matmul_dtype

    pm = p.astype(mdt)
    hm = h.astype(mdt)

    # e = P @ H^T (batched).  Contracting-dim dot_general: no explicit .T,
    # MXU operands stay in mdt, f32 accumulation.
    e = lax.dot_general(
        pm, hm,
        dimension_numbers=(((2,), (2,)), ((0,), (0,))),
        preferred_element_type=jnp.float32,
    )  # [Bt, Lp, Lh] f32

    # --- Row softmax over dim=2 (p_score), single full-size exp pass. ---
    m2 = jnp.max(e, axis=2, keepdims=True)                 # [Bt, Lp, 1]
    exp2 = jnp.exp(e - m2)                                 # [Bt, Lp, Lh]
    p_score = exp2 / jnp.sum(exp2, axis=2, keepdims=True)  # exact denominator

    # p_ = p_score @ hypothesis                            -> [Bt, Lp, H]
    p_att = lax.dot_general(
        p_score.astype(mdt), hm,
        dimension_numbers=(((2,), (1,)), ((0,), (0,))),
        preferred_element_type=jnp.float32,
    )

    # --- Column softmax over dim=1 (h_score), rebuilt from exp2. ---
    # exp(e - mb) = exp2 * exp(m2 - mb) with mb the per-batch max of m2;
    # only a tiny [Bt, Lp, 1] exp is needed (no second full-size exp pass).
    mb = jnp.max(m2, axis=1, keepdims=True)                # [Bt, 1, 1]
    n = exp2 * jnp.exp(m2 - mb)                            # [Bt, Lp, Lh]
    h_score = n / jnp.sum(n, axis=1, keepdims=True)        # exact denominator

    # h_ = h_score^T @ premise (contract over Lp; no materialized transpose)
    h_att = lax.dot_general(
        h_score.astype(mdt), pm,
        dimension_numbers=(((1,), (1,)), ((0,), (0,))),
        preferred_element_type=jnp.float32,
    )  # [Bt, Lh, H]

    # Elementwise tail in the *input* dtype: no live f32 copies of p / h when
    # inputs are bf16 (v6e/v7x have bf16 VALU; outputs are bf16 anyway).
    # TODO(synk): on v5e (no bf16 VALU) prefer f32 math here for bf16 inputs.
    pa = p_att.astype(p.dtype)
    ha = h_att.astype(h.dtype)

    if H % 128 == 0:
        # Direct lane-aligned slab stores: no Lp x 4H / Lh x 4H concat temp.
        mp_ref[:, :, 0:H] = p.astype(odt)
        mp_ref[:, :, H:2 * H] = pa.astype(odt)
        mp_ref[:, :, 2 * H:3 * H] = (p - pa).astype(odt)
        mp_ref[:, :, 3 * H:4 * H] = (p * pa).astype(odt)

        mh_ref[:, :, 0:H] = h.astype(odt)
        mh_ref[:, :, H:2 * H] = ha.astype(odt)
        mh_ref[:, :, 2 * H:3 * H] = (h - ha).astype(odt)
        mh_ref[:, :, 3 * H:4 * H] = (h * ha).astype(odt)
    else:
        # Wrapper guarantees 4*H % 128 == 0 here, so this single full-width
        # store is still lane-dense (unmasked vst).
        mp_ref[...] = jnp.concatenate([p, pa, p - pa, p * pa], axis=2).astype(odt)
        mh_ref[...] = jnp.concatenate([h, ha, h - ha, h * ha], axis=2).astype(odt)


def _tpu_vmem_capacity_bytes():
    """Physical VMEM per TensorCore; conservative fallback if unavailable."""
    try:
        cap = int(pltpu.get_tpu_info().vmem_capacity_bytes)
        if cap > 0:
            return cap
    except Exception:
        pass
    return 64 * _MiB  # v7x per-TensorCore VMEM (most restrictive generation)


def _vmem_estimate_bytes(bt, Lp, Lh, H, in_b, out_b, concat_path):
    """Per-grid-step VMEM footprint (double-buffered I/O + live temps)."""
    io = 2 * bt * (Lp + Lh) * H * in_b                 # double-buffered inputs
    io += 2 * bt * (Lp + Lh) * 4 * H * out_b           # double-buffered outputs
    tmp = 5 * bt * Lp * Lh * 4                         # e/exp2/n/scores + cast (f32-ish)
    tmp += 2 * bt * (Lp + Lh) * H * 4                  # p_att / h_att f32 results
    tmp += 2 * bt * (Lp + Lh) * H * in_b               # diff / prod temps
    if concat_path:
        tmp += bt * (Lp + Lh) * 4 * H * out_b          # concat temporaries
    tmp += 2 * _MiB                                    # Mosaic internal scratch margin
    return io + tmp


def _choose_batch_tile(B, Lp, Lh, H, in_b, out_b, budget_bytes, concat_path,
                       max_tile):
    """Largest divisor of B (<= max_tile) whose footprint fits the budget."""
    best = 1
    for bt in range(1, max(1, max_tile) + 1):
        if B % bt == 0 and _vmem_estimate_bytes(
                bt, Lp, Lh, H, in_b, out_b, concat_path) <= budget_bytes:
            best = bt
    return best


def _unpad_slabs(m, H, Hk):
    """m: [B, L, 4*Hk] with zero columns at [k*Hk+H, (k+1)*Hk); drop them."""
    return jnp.concatenate([m[:, :, k * Hk:k * Hk + H] for k in range(4)], axis=2)


def local_inference(premise, hypothesis, *, batch_tile=None,
                    vmem_budget_bytes=None, matmul_dtype=None):
    """premise: [B, Lp, H], hypothesis: [B, Lh, H] -> (m_p [B,Lp,4H], m_h [B,Lh,4H]).

    matmul_dtype: optional MXU operand dtype (e.g. jnp.bfloat16) for the
    compute-bound long-sequence regime; default keeps the input dtype.
    """
    B, Lp, H = premise.shape
    Bh, Lh, Hh = hypothesis.shape
    assert B == Bh and H == Hh

    out_dtype = premise.dtype
    in_b = jnp.dtype(premise.dtype).itemsize
    out_b = jnp.dtype(out_dtype).itemsize

    # Lane-dense outputs: pad H to a multiple of 32 so 4*H % 128 == 0.  Zero
    # padding keeps every output slab exactly zero in the padded columns, so
    # the exact-shape result is recovered by slicing in the wrapper.
    pad = (-H) % 32
    Hk = H + pad
    if pad:
        premise_k = jnp.pad(premise, ((0, 0), (0, 0), (0, pad)))
        hypothesis_k = jnp.pad(hypothesis, ((0, 0), (0, 0), (0, pad)))
    else:
        premise_k, hypothesis_k = premise, hypothesis
    concat_path = (Hk % 128 != 0)

    # Generation-aware VMEM budgeting (v5e/v6e: 128 MiB, v7x: 64 MiB per TC).
    vmem_cap = _tpu_vmem_capacity_bytes()
    if vmem_budget_bytes is None:
        vmem_budget_bytes = max(32 * _MiB, vmem_cap - 16 * _MiB)

    # Keep >= 2 grid steps when possible: feeds both TensorCores on v7x
    # (the batch axis is "parallel") and lets prefetch/writeback overlap.
    min_steps = 2 if B >= 2 else 1

    if batch_tile is None:
        batch_tile = _choose_batch_tile(B, Lp, Lh, Hk, in_b, out_b,
                                        vmem_budget_bytes, concat_path,
                                        max_tile=B // min_steps)
    Bt = int(batch_tile)
    assert B % Bt == 0, "batch_tile must divide the batch size"
    grid = (B // Bt,)

    est = _vmem_estimate_bytes(Bt, Lp, Lh, Hk, in_b, out_b, concat_path)
    # Never request more than physical VMEM (leave headroom below the cap).
    vmem_limit = int(min(vmem_cap - 4 * _MiB, max(32 * _MiB, int(1.25 * est))))

    kernel = functools.partial(_local_inference_kernel, matmul_dtype=matmul_dtype)

    grid_spec = pltpu.PrefetchScalarGridSpec(
        num_scalar_prefetch=0,
        grid=grid,
        in_specs=[
            pl.BlockSpec((Bt, Lp, Hk), lambda b: (b, 0, 0)),
            pl.BlockSpec((Bt, Lh, Hk), lambda b: (b, 0, 0)),
        ],
        out_specs=[
            pl.BlockSpec((Bt, Lp, 4 * Hk), lambda b: (b, 0, 0)),
            pl.BlockSpec((Bt, Lh, 4 * Hk), lambda b: (b, 0, 0)),
        ],
    )

    m_p, m_h = pl.pallas_call(
        kernel,
        out_shape=(
            jax.ShapeDtypeStruct((B, Lp, 4 * Hk), out_dtype),
            jax.ShapeDtypeStruct((B, Lh, 4 * Hk), out_dtype),
        ),
        grid_spec=grid_spec,
        compiler_params=pltpu.CompilerParams(
            dimension_semantics=("parallel",),
            vmem_limit_bytes=vmem_limit,
        ),
    )(premise_k, hypothesis_k)

    if pad:
        m_p = _unpad_slabs(m_p, H, Hk)
        m_h = _unpad_slabs(m_h, H, Hk)
    return m_p, m_h


def _reference(premise, hypothesis):
    # Pure-JAX reference mirroring the PyTorch module.
    e = jnp.einsum("bph,bqh->bpq", premise, hypothesis)
    p_score = jax.nn.softmax(e, axis=2)
    h_score = jax.nn.softmax(e, axis=1)
    p_ = jnp.einsum("bpq,bqh->bph", p_score, hypothesis)
    h_ = jnp.einsum("bpq,bph->bqh", h_score, premise)
    m_p = jnp.concatenate([premise, p_, premise - p_, premise * p_], axis=2)
    m_h = jnp.concatenate([hypothesis, h_, hypothesis - h_, hypothesis * h_], axis=2)
    return m_p, m_h


def _check(m, m_ref, atol=5e-3, rtol=5e-3):
    # Softmax reciprocals are exact now; tolerance only has to cover default
    # MXU f32 matmul precision differences between Mosaic and the XLA ref.
    assert jnp.allclose(m, m_ref, atol=atol, rtol=rtol), float(
        jnp.max(jnp.abs(m - m_ref)))


if __name__ == "__main__":
    # LocalInferenceModel has no learnable parameters; only inputs are needed.
    B, Lp, Lh, H = 2, 8, 8, 32  # hidden_size * bi_num = 32
    key = jax.random.PRNGKey(0)
    kp, kh = jax.random.split(key)
    premise = jax.random.normal(kp, (B, Lp, H), dtype=jnp.float32)
    hypothesis = jax.random.normal(kh, (B, Lh, H), dtype=jnp.float32)

    m_p, m_h = local_inference(premise, hypothesis)
    jax.block_until_ready((m_p, m_h))
    m_p_ref, m_h_ref = _reference(premise, hypothesis)
    assert m_p.shape == (B, Lp, 4 * H) and m_h.shape == (B, Lh, 4 * H)
    _check(m_p, m_p_ref)
    _check(m_h, m_h_ref)

    # Exercise the lane-padding path (4*H not a multiple of 128) with
    # unequal premise/hypothesis lengths.
    H2, Lh2 = 24, 16
    k2p, k2h = jax.random.split(jax.random.PRNGKey(1))
    prem2 = jax.random.normal(k2p, (B, Lp, H2), dtype=jnp.float32)
    hyp2 = jax.random.normal(k2h, (B, Lh2, H2), dtype=jnp.float32)
    mp2, mh2 = local_inference(prem2, hyp2)
    jax.block_until_ready((mp2, mh2))
    mp2_ref, mh2_ref = _reference(prem2, hyp2)
    assert mp2.shape == (B, Lp, 4 * H2) and mh2.shape == (B, Lh2, 4 * H2)
    _check(mp2, mp2_ref)
    _check(mh2, mh2_ref)

    # Exercise the direct slab-store path (H % 128 == 0).
    H3 = 128
    k3p, k3h = jax.random.split(jax.random.PRNGKey(2))
    prem3 = jax.random.normal(k3p, (B, Lp, H3), dtype=jnp.float32)
    hyp3 = jax.random.normal(k3h, (B, Lh, H3), dtype=jnp.float32)
    mp3, mh3 = local_inference(prem3, hyp3)
    jax.block_until_ready((mp3, mh3))
    mp3_ref, mh3_ref = _reference(prem3, hyp3)
    _check(mp3, mp3_ref)
    _check(mh3, mh3_ref)

    print("KERNEL_OK")
</pallas_src>

<mosaic_0001>
module attributes {stable_mosaic.version = 11 : i64} {
  func.func @_local_inference_kernel(%arg0: i32, %arg1: memref<1x8x32xf32, #tpu.memory_space<vmem>>, %arg2: memref<1x8x32xf32, #tpu.memory_space<vmem>>, %arg3: memref<1x8x128xf32, #tpu.memory_space<vmem>>, %arg4: memref<1x8x128xf32, #tpu.memory_space<vmem>>) attributes {dimension_semantics = [#tpu.dimension_semantics<parallel>], iteration_bounds = array<i64: 2>, scalar_prefetch = 0 : i64, scratch_operands = 0 : i64, tpu.core_type = #tpu.core_type<tc>, window_params = [{transform_indices = @transform_0, window_bounds = array<i64: 1, 8, 32>}, {transform_indices = @transform_1, window_bounds = array<i64: 1, 8, 32>}, {transform_indices = @transform_2, window_bounds = array<i64: 1, 8, 128>}, {transform_indices = @transform_3, window_bounds = array<i64: 1, 8, 128>}]} {
    %c0 = arith.constant 0 : index
    %c0_0 = arith.constant 0 : index
    %c0_1 = arith.constant 0 : index
    %0 = vector.load %arg1[%c0, %c0_0, %c0_1] : memref<1x8x32xf32, #tpu.memory_space<vmem>>, vector<1x8x32xf32>
    %c0_2 = arith.constant 0 : index
    %c0_3 = arith.constant 0 : index
    %c0_4 = arith.constant 0 : index
    %1 = vector.load %arg2[%c0_2, %c0_3, %c0_4] : memref<1x8x32xf32, #tpu.memory_space<vmem>>, vector<1x8x32xf32>
    %cst = arith.constant dense<0.000000e+00> : vector<1x8x8xf32>
    %2 = tpu.matmul %0, %1, %cst {dimension_numbers = #tpu.dot_dimension_numbers<[2], [2], [1], [1], [0, 0, 0, 1, 1, 1], [0], [0]>} : vector<1x8x32xf32>, vector<1x8x32xf32>, vector<1x8x8xf32> -> vector<1x8x8xf32>
    %cst_5 = arith.constant dense<0xFF800000> : vector<1x8xf32>
    %3 = vector.multi_reduction <maximumf>, %2, %cst_5 [2] : vector<1x8x8xf32> to vector<1x8xf32>
    %4 = vector.shape_cast %3 : vector<1x8xf32> to vector<1x8x1xf32>
    %5 = vector.broadcast %4 : vector<1x8x1xf32> to vector<1x8x8xf32>
    %6 = arith.subf %2, %5 : vector<1x8x8xf32>
    %7 = math.exp %6 : vector<1x8x8xf32>
    %cst_6 = arith.constant dense<0.000000e+00> : vector<1x8xf32>
    %8 = vector.multi_reduction <add>, %7, %cst_6 [2] : vector<1x8x8xf32> to vector<1x8xf32>
    %9 = vector.shape_cast %8 : vector<1x8xf32> to vector<1x8x1xf32>
    %10 = vector.broadcast %9 : vector<1x8x1xf32> to vector<1x8x8xf32>
    %11 = arith.divf %7, %10 : vector<1x8x8xf32>
    %cst_7 = arith.constant dense<0.000000e+00> : vector<1x8x32xf32>
    %12 = tpu.matmul %11, %1, %cst_7 {dimension_numbers = #tpu.dot_dimension_numbers<[2], [1], [1], [2], [0, 0, 0, 1, 1, 2], [0], [0]>} : vector<1x8x8xf32>, vector<1x8x32xf32>, vector<1x8x32xf32> -> vector<1x8x32xf32>
    %cst_8 = arith.constant dense<0xFF800000> : vector<1x1xf32>
    %13 = vector.multi_reduction <maximumf>, %4, %cst_8 [1] : vector<1x8x1xf32> to vector<1x1xf32>
    %14 = vector.shape_cast %13 : vector<1x1xf32> to vector<1x1x1xf32>
    %15 = vector.broadcast %14 : vector<1x1x1xf32> to vector<1x8x1xf32>
    %16 = arith.subf %4, %15 : vector<1x8x1xf32>
    %17 = math.exp %16 : vector<1x8x1xf32>
    %18 = vector.broadcast %17 : vector<1x8x1xf32> to vector<1x8x8xf32>
    %19 = arith.mulf %7, %18 : vector<1x8x8xf32>
    %cst_9 = arith.constant dense<0.000000e+00> : vector<1x8xf32>
    %20 = vector.multi_reduction <add>, %19, %cst_9 [1] : vector<1x8x8xf32> to vector<1x8xf32>
    %21 = vector.shape_cast %20 : vector<1x8xf32> to vector<1x1x8xf32>
    %22 = vector.broadcast %21 : vector<1x1x8xf32> to vector<1x8x8xf32>
    %23 = arith.divf %19, %22 : vector<1x8x8xf32>
    %cst_10 = arith.constant dense<0.000000e+00> : vector<1x8x32xf32>
    %24 = tpu.matmul %23, %0, %cst_10 {dimension_numbers = #tpu.dot_dimension_numbers<[1], [1], [2], [2], [0, 0, 0, 2, 1, 2], [0], [0]>} : vector<1x8x8xf32>, vector<1x8x32xf32>, vector<1x8x32xf32> -> vector<1x8x32xf32>
    %25 = arith.subf %0, %12 : vector<1x8x32xf32>
    %26 = arith.mulf %0, %12 : vector<1x8x32xf32>
    %27 = tpu.concatenate %0, %12, %25, %26 in 2 : vector<1x8x32xf32>, vector<1x8x32xf32>, vector<1x8x32xf32>, vector<1x8x32xf32> -> vector<1x8x128xf32>
    %c0_11 = arith.constant 0 : index
    %c0_12 = arith.constant 0 : index
    %c0_13 = arith.constant 0 : index
    %28 = vector.load %arg3[%c0_11, %c0_12, %c0_13] : memref<1x8x128xf32, #tpu.memory_space<vmem>>, vector<1x8x128xf32>
    tpu.vector_store %arg3[%c0_11, %c0_12, %c0_13], %27 {strides = array<i32>} : memref<1x8x128xf32, #tpu.memory_space<vmem>>, vector<1x8x128xf32>,
    %29 = arith.subf %1, %24 : vector<1x8x32xf32>
    %30 = arith.mulf %1, %24 : vector<1x8x32xf32>
    %31 = tpu.concatenate %1, %24, %29, %30 in 2 : vector<1x8x32xf32>, vector<1x8x32xf32>, vector<1x8x32xf32>, vector<1x8x32xf32> -> vector<1x8x128xf32>
    %c0_14 = arith.constant 0 : index
    %c0_15 = arith.constant 0 : index
    %c0_16 = arith.constant 0 : index
    %32 = vector.load %arg4[%c0_14, %c0_15, %c0_16] : memref<1x8x128xf32, #tpu.memory_space<vmem>>, vector<1x8x128xf32>
    tpu.vector_store %arg4[%c0_14, %c0_15, %c0_16], %31 {strides = array<i32>} : memref<1x8x128xf32, #tpu.memory_space<vmem>>, vector<1x8x128xf32>,
    return
  }
  func.func @transform_0(%arg0: i32) -> (i32, i32, i32) {
    %c0_i32 = arith.constant 0 : i32
    %c0_i32_0 = arith.constant 0 : i32
    %c0_i32_1 = arith.constant 0 : i32
    return %arg0, %c0_i32, %c0_i32_0 : i32, i32, i32
  }
  func.func @transform_1(%arg0: i32) -> (i32, i32, i32) {
    %c0_i32 = arith.constant 0 : i32
    %c0_i32_0 = arith.constant 0 : i32
    %c0_i32_1 = arith.constant 0 : i32
    return %arg0, %c0_i32, %c0_i32_0 : i32, i32, i32
  }
  func.func @transform_2(%arg0: i32) -> (i32, i32, i32) {
    %c0_i32 = arith.constant 0 : i32
    %c0_i32_0 = arith.constant 0 : i32
    %c0_i32_1 = arith.constant 0 : i32
    return %arg0, %c0_i32, %c0_i32_0 : i32, i32, i32
  }
  func.func @transform_3(%arg0: i32) -> (i32, i32, i32) {
    %c0_i32 = arith.constant 0 : i32
    %c0_i32_0 = arith.constant 0 : i32
    %c0_i32_1 = arith.constant 0 : i32
    return %arg0, %c0_i32, %c0_i32_0 : i32, i32, i32
  }
}

</mosaic_0001>

<bundles_post_ra>
// kernel: tpu_custom_call.1
= control target key start
LH: loop header
LB: loop body
LE: loop exit
PB: predicated region body
PF: predicated region fallthrough
CT: control target
= control target key end

     0   :  { %9 = vsyncpa [#allocation3], 0  ;;  %s1089_s0 = inlined_call_operand.hbm [shape: f32[2,8,32], index: 0, kind: input, shape index: {}]   ;;  %s1090_s1 = inlined_call_operand.hbm [shape: f32[2,8,32], index: 1, kind: input, shape index: {}]   ;;  %s1091_s2 = inlined_call_operand.hbm [shape: f32[2,8,128], index: 2, kind: output, shape index: {0}]   ;;  %s1092_s3 = inlined_call_operand.hbm [shape: f32[2,8,128], index: 3, kind: output, shape index: {1}]  }
   0x1   :  { %11 = vsyncpa [#allocation3 + $0x1], 0 }
   0x2   :  { %12 = vsyncpa [#allocation6], 0 }
   0x3   :  { %14 = vsyncpa [#allocation6 + $0x1], 0 }
   0x4   :  { %15 = vsyncpa [#allocation4], 0 }
   0x5   :  { %17 = vsyncpa [#allocation4 + $0x1], 0 }
   0x6   :  { %18 = vsyncpa [#allocation9], 0 }
   0x7   :  { %20 = vsyncpa [#allocation9 + $0x1], 0  ;;  %s878_s12 = smov 0   ;;  %s880_s13 = smov 0  }
   0x8   :  { %s882_s14 = smov 0   ;;  %s884_s15 = smov 0  }
   0x9 LB: > { %s899_s16 = sadd.s32 4294967295, %s853_s15   ;;  %s601_s17 = sadd.s32 4294967294, %s853_s15   ;;  %s853_s15 = sphi %s884_s15, %s1103_s15   ;;  %s849_s14 = sphi %s882_s14, %s1102_s14   ;;  %s845_s13 = sphi %s880_s13, %s1101_s13   ;;  %s841_s12 = sphi %s878_s12, %s1100_s12  }
   0xa   : > { %s903_s18 = sadd.s32 1, %s853_s15   ;;  %s33_s19 = sadd.s32 1, %s849_s14 }
   0xb   : > { %s30_s20 = ssub.s32 %s853_s15, %s903_s18  ;;  %p40_p0 = scmp.ne.s32.totalorder %s849_s14, %s845_s13 }
   0xc   : > { %p31_p1 = scmp.eq.s32.totalorder %s30_s20, 0  ;;  %p41_p2 = scmp.eq.s32.totalorder %s853_s15, 0 }
   0xd   : > { %p46_p3 = scmp.ne.s32.totalorder %s845_s13, %s841_s12  ;;  %p47_p4 = scmp.eq.s32.totalorder %s899_s16, 0 }
   0xe   : > { %s915_s21 = scalar_select %p31_p1, %s849_s14, %s33_s19  }
   0xf   : > { %p917_p5 = por %p41_p2, %p40_p0  ;;  %p921_p6 = por %p47_p4, %p46_p3 }
  0x10   : > { %p96_p7 = scmp.eq.s32.totalorder %s899_s16, 1  ;;  %p102_p8 = scmp.eq.s32.totalorder %s601_s17, 1 }
  0x11   : > { %p645_p10 = scmp.lt.s32.totalorder %s853_s15, 2  ;;  %s937_s26 = sand.u32 1, %s849_s14  }
  0x12   : > { %p928_p11 = por %p96_p7, %p40_p0  ;;  %p932_p12 = por %p102_p8, %p46_p3 }
  0x13   : > { %s605_s27 = sshll.u32 %s853_s15, 3  ;;  %s604_s28 = sshll.u32 %s937_s26, 3 }
  0x14   : > { %s156_s4 = scalar_lea.hbm %s1089_s0, %s605_s27  ;;  %s152_s6 = scalar_lea.vmem [#allocation2], %s604_s28 }
  0x15   : > { %s158_s5 = sshll.u32 %s156_s4, 4  ;;  %s160_s7 = sshll.u32 %s152_s6, 4  ;;  %s159_s5 = int_to_ptr.hbm [resolvable:$true] %s158_s5  ;;  %s161_s7 = int_to_ptr.vmem [resolvable:$true] %s160_s7 }
  0x16   : > { %p946_p13 = pnand %p645_p10, %p917_p5  ;;  %p608_p0 = scmp.ge.s32.totalorder %s853_s15, 1 }
  0x17   : > { %p184_p1 = scmp.lt.s32.totalorder %s853_s15, 3  ;;  %s149_s9 = scalar_lea.sflag [#allocation3], %s937_s26 }
  0x18   : > { %s691_s10 = sshra.s32 %s159_s5, 4  ;;  %p695_p3 = pneg %p946_p13  ;;  %s692_s10 = int_to_ptr.hbm [resolvable:$true] %s691_s10 }
  0x19   : > { %s693_s11 = scalar_lea.hbm %s692_s10, 8  ;;  %s698_s20 = scalar_lea.hbm %s1089_s0, 16 }
  0x1a   : > { %p694_p2 = scmp.ne.s32.totalorder %s692_s10, %s693_s11  ;;  %p699_p5 = scmp.lt.s32.totalorder %s692_s10, %s1089_s0 }
  0x1b   : > { %p700_p8 = scmp.lt.s32.totalorder %s698_s20, %s693_s11 }
  0x1c   : > { %p696_p4 = pnand %p695_p3, %p694_p2 }
  0x1d   : > { %p701_p10 = por %p700_p8, %p699_p5 }
  0x1e   : > { %p697_p7 = pneg %p696_p4 }
  0x20   : > { %p702_p9 = pnand %p701_p10, %p697_p7 }
  0x22   : > { %705 = shalt.err (!%p702_p9)
}
  0x23   : > { %634 = dma.hbm_to_vmem [thread:$0]  (!%p946_p13), %s159_s5, 128, %s161_s7, %s149_s9  }
  0x24   : > { %p970_p2 = pnand %p608_p0, %p184_p1  ;;  %s175_s10 = scalar_lea.hbm %s1090_s1, %s605_s27 }
  0x25   : > { %s177_s11 = sshll.u32 %s175_s10, 4  ;;  %s171_s17 = scalar_lea.vmem [#allocation5], %s604_s28  ;;  %s178_s11 = int_to_ptr.hbm [resolvable:$true] %s177_s11 }
  0x26   : > { %s179_s19 = sshll.u32 %s171_s17, 4  ;;  %s168_s20 = scalar_lea.sflag [#allocation6], %s937_s26  ;;  %s180_s19 = int_to_ptr.vmem [resolvable:$true] %s179_s19 }
  0x27   : > { %s721_s22 = sshra.s32 %s178_s11, 4  ;;  %s728_s9 = scalar_lea.hbm %s1090_s1, 16  ;;  %s722_s22 = int_to_ptr.hbm [resolvable:$true] %s721_s22 }
  0x28   : > { %s723_s29 = scalar_lea.hbm %s722_s22, 8  ;;  %p729_p4 = scmp.lt.s32.totalorder %s722_s22, %s1090_s1 }
  0x29   : > { %p724_p9 = scmp.ne.s32.totalorder %s722_s22, %s723_s29  ;;  %p730_p7 = scmp.lt.s32.totalorder %s728_s9, %s723_s29 }
  0x2b   : > { %p726_p0 = pnand %p724_p9, %p695_p3  ;;  %p731_p5 = por %p730_p7, %p729_p4 }
  0x2d   : > { %p727_p1 = pneg %p726_p0 }
  0x2f   : > { %p732_p8 = pnand %p731_p5, %p727_p1 }
  0x31   : > { %735 = shalt.err (!%p732_p8)
}
  0x32   : > { %637 = dma.hbm_to_vmem [thread:$0]  (!%p946_p13), %s178_s11, 128, %s180_s19, %s168_s20  }
  0x33   : > { %188 = sbr.rel (%p970_p2) target bundleno = 785 (0x311), region = 28  ;;  %s992_s26 = sand.u32 (!%p970_p2), 1, %s845_s13  }
  0x34   : > { %s995_s28 = sshll.u32 (!%p970_p2), %s992_s26, 3  ;;  %s191_s6 = scalar_lea.sflag (!%p970_p2), [#allocation3], %s992_s26 }
  0x35   : > { %s194_s10 = scalar_lea.vmem (!%p970_p2), [#allocation2], %s995_s28 }
  0x38   : > { %824 = dma.done.wait (%p921_p6), %s191_s6, 128  }
  0x39   : > { %826 = vsyncadd (%p921_p6), %s191_s6, 4294967168  ;;  %s201_s8 = scalar_lea.sflag [#allocation6], %s992_s26  ;;  %s204_s30 = scalar_lea.vmem [#allocation5], %s995_s28 }
  0x3a   : > { %828 = dma.done.wait (%p921_p6), %s201_s8, 128  }
  0x3b   : > { %830 = vsyncadd (%p921_p6), %s201_s8, 4294967168  ;;  %vm240_vm0 = vcmask 261120   ;;  %v1009_v0 = vld [vmem:[%s204_s30] sm:$0xff]  ;;  %v1013_v1 = vld [vmem:[%s194_s10] sm:$0xff]  ;;  %vm267_vm1 = vcmask 64512   ;;  %s855_s23 = smov 32  }
  0x3c   : > { %613 = vmatpush.xpose.msk.msra.mxu0 %vm240_vm0, %v1009_v0  ;;  %310 = vmatpush.msra.mxu1 %v1009_v0  ;;  %s856_s11 = smov 64   ;;  %s857_s17 = smov 96   ;;  %vm417_vm10 = vcmask 523264   ;;  %vm419_vm11 = vcmask 785408  }
  0x3d   : > { %397 = vmatpush.msra.mxu2 %v1013_v1  ;;  %s619_s19 = sshll.u32 %s899_s16, 3  ;;  %s230_s5 = scalar_lea.vmem [#allocation7], %s995_s28 }
  0x3e   : > { %s456_s29 = scalar_lea.hbm %s1091_s2, %s619_s19  ;;  %s458_s7 = sshll.u32 %s230_s5, 4  ;;  %s459_s7 = int_to_ptr.vmem [resolvable:$true] %s458_s7 }
  0x3f   : > { %614 = vmatmul.msk.f32.vlgmr.msra.gmra.mxu0 %vm240_vm0, %v1013_v1  ;;  %s460_s9 = sshll.u32 %s456_s29, 4  ;;  %s441_s4 = scalar_lea.sflag [#allocation4], %s992_s26  ;;  %s461_s9 = int_to_ptr.hbm [resolvable:$true] %s460_s9 }
  0x40   : > { %s765_s27 = sshra.s32 %s461_s9, 4  ;;  %s771_s30 = scalar_lea.hbm %s1091_s2, 16  ;;  %s766_s27 = int_to_ptr.hbm [resolvable:$true] %s765_s27 }
  0x41   : > { %s767_s6 = scalar_lea.hbm %s766_s27, 8  ;;  %p772_p10 = scmp.lt.s32.totalorder %s766_s27, %s1091_s2 }
  0x42   : > { %p768_p6 = scmp.ne.s32.totalorder %s766_s27, %s767_s6  ;;  %p773_p2 = scmp.lt.s32.totalorder %s771_s30, %s767_s6 }
  0x44   : > { %p769_p13 = pnand %p768_p6, %p928_p11  ;;  %p774_p9 = por %p773_p2, %p772_p10 }
  0x46   : > { %p770_p3 = pneg %p769_p13 }
  0x48   : > { %p775_p0 = pnand %p774_p9, %p770_p3 }
  0xbc   : > { %v264_v2 = vpop.f32.mrf.mxu0 }
  0xbd   : > { %v268_v3 = vsel %vm267_vm1, %v264_v2, -inf }
  0xbe   : > { %269 = vmax.xlane.f32.xlu0 %v268_v3 }
 0x131   : > { %v270_v4 = vpop.xlane.xlu0 %269 }
 0x132   : > { %v271_v5 = vsub.f32 %v264_v2, %v270_v4  ;;  %v315_v6 = vrot.slane %v270_v4, 4 }
 0x134   : > { %v272_v7 = vmul.f32 1.442695, %v271_v5  ;;  %v316_v8 = vmax.f32 %v270_v4, %v315_v6 }
 0x136   : > { %683 = vpow2.f32 %v272_v7  ;;  %v317_v9 = vrot.slane %v316_v8, 2 }
 0x138   : > { %v318_v10 = vmax.f32 %v316_v8, %v317_v9 }
 0x13a   : > { %v319_v11 = vrot.slane %v318_v10, 1 }
 0x13c   : > { %v684_v12 = vpop.eup %683  ;;  %v320_v13 = vmax.f32 %v318_v10, %v319_v11 }
 0x13d   : > { %v274_v14 = vsel %vm267_vm1, %v684_v12, 0.0 }
 0x13e   : > { %v321_v15 = vsub.f32 %v270_v4, %v320_v13  ;;  %275 = vadd.xlane.f32.xlu0 %v274_v14 }
 0x140   : > { %v322_v16 = vmul.f32 1.442695, %v321_v15 }
 0x142   : > { %685 = vpow2.f32 %v322_v16 }
 0x148   : > { %v686_v17 = vpop.eup %685 }
 0x149   : > { %v324_v18 = vmul.f32 %v686_v17, %v684_v12 }
 0x14b   : > { %v325_v19 = vsel %vm267_vm1, %v324_v18, 0.0 }
 0x14c   : > { %v326_v20 = vrot.slane %v325_v19, 4 }
 0x14e   : > { %v327_v21 = vadd.f32 %v326_v20, %v325_v19 }
 0x150   : > { %v328_v22 = vrot.slane %v327_v21, 2 }
 0x152   : > { %v329_v23 = vadd.f32 %v328_v22, %v327_v21 }
 0x154   : > { %v330_v24 = vrot.slane %v329_v23, 1 }
 0x156   : > { %v331_v25 = vadd.f32 %v330_v24, %v329_v23 }
 0x158   : > { %687 = vrcp.f32 %v331_v25  ;;  %v343_v29 = vand.u32 2147483648, %v331_v25  ;;  %v341_v31 = vand.u32 2147483647, %v331_v25  ;;  %vm337_vm3 = vweird.f32 %v331_v25 }
 0x15a   : > { %v344_v33 = vor.u32 1.1754944e-38, %v343_v29  ;;  %vm342_vm5 = vcmp.eq.f32.partialorder %v341_v31, 8.507059e+37 }
 0x15e   : > { %v688_v26 = vpop.eup %687 }
 0x15f   : > { %v333_v27 = vmul.f32 %v688_v26, %v331_v25  ;;  %vm338_vm2 = vweird.f32 %v688_v26 }
 0x160   : > { %vm339_vm4 = vmor %vm337_vm3, %vm338_vm2 }
 0x161   : > { %v334_v28 = vsub.f32 1.0, %v333_v27 }
 0x163   : > { %v335_v30 = vmul.f32 %v688_v26, %v334_v28 }
 0x165   : > { %v336_v32 = vadd.f32 %v688_v26, %v335_v30 }
 0x167   : > { %v340_v34 = vsel %vm339_vm4, %v688_v26, %v336_v32 }
 0x168   : > { %v345_v35 = vsel %vm342_vm5, %v344_v33, %v340_v34 }
 0x169   : > { %v346_v36 = vmul.f32 %v345_v35, %v324_v18 }
 0x16b   : > { %347 = vxpose.xlu1.b32.start.end [1/1] (short) (narrow) %v346_v36, 8 }
 0x1b1   : > { %v276_v37 = vpop.xlane.xlu0 %275 }
 0x1b2   : > { %689 = vrcp.f32 %v276_v37  ;;  %v288_v41 = vand.u32 2147483648, %v276_v37  ;;  %v286_v43 = vand.u32 2147483647, %v276_v37  ;;  %vm282_vm7 = vweird.f32 %v276_v37 }
 0x1b4   : > { %v289_v45 = vor.u32 1.1754944e-38, %v288_v41  ;;  %vm287_vm9 = vcmp.eq.f32.partialorder %v286_v43, 8.507059e+37 }
 0x1b8   : > { %v690_v38 = vpop.eup %689 }
 0x1b9   : > { %v278_v39 = vmul.f32 %v690_v38, %v276_v37  ;;  %vm283_vm6 = vweird.f32 %v690_v38 }
 0x1ba   : > { %vm284_vm8 = vmor %vm282_vm7, %vm283_vm6 }
 0x1bb   : > { %v279_v40 = vsub.f32 1.0, %v278_v39 }
 0x1bd   : > { %v280_v42 = vmul.f32 %v690_v38, %v279_v40 }
 0x1bf   : > { %v281_v44 = vadd.f32 %v690_v38, %v280_v42 }
 0x1c1   : > { %v285_v46 = vsel %vm284_vm8, %v690_v38, %v281_v44 }
 0x1c2   : > { %v290_v47 = vsel %vm287_vm9, %v289_v45, %v285_v46 }
 0x1c3   : > { %v291_v48 = vmul.f32 %v684_v12, %v290_v47 }
 0x1c5   : > { %615 = vmatmul.msk.f32.vlgmr.msra.gmra.mxu1 %vm267_vm1, %v291_v48 }
 0x20f   : > { %v363_v49 = vpop.trf.xlu1 }
 0x210   : > { %616 = vmatmul.msk.f32.vlgmr.msra.gmra.mxu2 %vm267_vm1, %v363_v49 }
 0x242   : > { %v312_v50 = vpop.f32.mrf.mxu1 }
 0x243   : > { %405 = vrot.lane.b32.xlu1 %v312_v50, %s855_s23  ;;  %v402_v53 = vsub.f32 %v1013_v1, %v312_v50  ;;  %v403_v54 = vmul.f32 %v312_v50, %v1013_v1 }
 0x293   : > { %v399_v51 = vpop.f32.mrf.mxu2 }
 0x294   : > { %v422_v52 = vsub.f32 %v1009_v0, %v399_v51  ;;  %425 = vrot.lane.b32.xlu2 %v399_v51, %s855_s23  ;;  %v423_v55 = vmul.f32 %v399_v51, %v1009_v0 }
 0x296   : > { %429 = vrot.lane.b32.xlu0 %v422_v52, %s856_s11 }
 0x29c   : > { %409 = vrot.lane.b32.xlu2 %v402_v53, %s856_s11 }
 0x2a4   : > { %413 = vrot.lane.b32.xlu2 %v403_v54, %s857_s17 }
 0x2ac   : > { %433 = vrot.lane.b32.xlu2 %v423_v55, %s857_s17 }
 0x2b5   : > { %v406_v58 = vpop.permute.xlu1 %405 }
 0x2b6   : > { %v416_v59 = vsel %vm240_vm0, %v1013_v1, %v406_v58 }
 0x2ee   : > { %v426_v56 = vpop.permute.xlu2 %425 }
 0x2f6   : > { %v410_v57 = vpop.permute.xlu2 %409 }
 0x2f7   : > { %v418_v60 = vsel %vm417_vm10, %v416_v59, %v410_v57 }
 0x2fe   : > { %v414_v61 = vpop.permute.xlu2 %413 }
 0x2ff   : > { %v420_v62 = vsel %vm419_vm11, %v418_v60, %v414_v61 }
 0x300   : > { %421 = vst [vmem:[%s230_s5] sm:$0xff] %v420_v62 }
 0x301   : > { %778 = shalt.err (!%p775_p0)
}
 0x302   : > { %627 = dma.vmem_to_hbm [thread:$0]  (%p928_p11), %s459_s7, 128, %s461_s9, %s441_s4   ;;  %v436_v63 = vsel %vm240_vm0, %v1009_v0, %v426_v56 }
 0x303   : > { %s470_s22 = scalar_lea.hbm %s1092_s3, %s619_s19  ;;  %s237_s29 = scalar_lea.vmem [#allocation8], %s995_s28 }
 0x304   : > { %s472_s5 = sshll.u32 %s237_s29, 4  ;;  %s474_s10 = sshll.u32 %s470_s22, 4  ;;  %s473_s5 = int_to_ptr.vmem [resolvable:$true] %s472_s5  ;;  %s475_s10 = int_to_ptr.hbm [resolvable:$true] %s474_s10 }
 0x305   : > { %s446_s16 = scalar_lea.sflag [#allocation9], %s992_s26  ;;  %s793_s7 = sshra.s32 %s475_s10, 4  ;;  %s794_s7 = int_to_ptr.hbm [resolvable:$true] %s793_s7 }
 0x306   : > { %v434_v2 = vpop.permute.xlu2 %433  ;;  %s795_s19 = scalar_lea.hbm %s794_s7, 8  ;;  %s799_s4 = scalar_lea.hbm %s1092_s3, 16 }
 0x307   : > { %p796_p1 = scmp.ne.s32.totalorder %s794_s7, %s795_s19  ;;  %p800_p5 = scmp.lt.s32.totalorder %s794_s7, %s1092_s3 }
 0x308   : > { %v430_v1 = vpop.permute.xlu0 %429  ;;  %p801_p8 = scmp.lt.s32.totalorder %s799_s4, %s795_s19 }
 0x309   : > { %v437_v3 = vsel %vm417_vm10, %v436_v63, %v430_v1  ;;  %p797_p4 = pnand %p796_p1, %p928_p11 }
 0x30a   : > { %v438_v4 = vsel %vm419_vm11, %v437_v3, %v434_v2  ;;  %p802_p6 = por %p801_p8, %p800_p5 }
 0x30b   : > { %439 = vst [vmem:[%s237_s29] sm:$0xff] %v438_v4  ;;  %p798_p7 = pneg %p797_p4 }
 0x30d   : > { %p803_p13 = pnand %p802_p6, %p798_p7 }
 0x30f   : > { %806 = shalt.err (!%p803_p13)
}
 0x310   : > { %628 = dma.vmem_to_hbm [thread:$0]  (%p928_p11), %s473_s5, 128, %s475_s10, %s446_s16  }
 0x311 PF: > { %s486_s26 = sand.u32 1, %s841_s12   ;;  %p1099_p3 = scmp.ge.s32.totalorder %s853_s15, 2 }
 0x312   : > { %s487_s8 = scalar_lea.sflag [#allocation4], %s486_s26 }
 0x313   : > { %p639_p10 = pnand %p1099_p3, %p932_p12 }
 0x315   : > { %p640_p2 = pneg %p639_p10 }
 0x317   : > { %832 = dma.done.wait (%p640_p2), %s487_s8, 128  }
 0x318   : > { %834 = vsyncadd (%p640_p2), %s487_s8, 4294967168  ;;  %s497_s30 = scalar_lea.sflag [#allocation9], %s486_s26 }
 0x319   : > { %836 = dma.done.wait (%p640_p2), %s497_s30, 128  }
 0x31a   : > { %838 = vsyncadd (%p640_p2), %s497_s30, 4294967168  ;;  %p23_p11 = scmp.ge.s32.totalorder %s903_s18, 4   ;;  %s1100_s12 = smov %s845_s13 }
 0x31b   : > { %s1101_s13 = smov %s849_s14  ;;  %s1102_s14 = smov %s915_s21 }
 0x31c   : > { %s1103_s15 = smov %s903_s18  ;;  %25 = sbr.rel (!%p23_p11) target bundleno = 9 (0x9), region = 103 }
 0x321   :  { %503 = vsyncpa [#allocation3], 1 }
 0x322   :  { %505 = vsyncpa [#allocation3 + $0x1], 1 }
 0x323   :  { %506 = vsyncpa [#allocation6], 1 }
 0x324   :  { %508 = vsyncpa [#allocation6 + $0x1], 1 }
 0x325   :  { %509 = vsyncpa [#allocation4], 1 }
 0x326   :  { %511 = vsyncpa [#allocation4 + $0x1], 1 }
 0x327   :  { %512 = vsyncpa [#allocation9], 1 }
 0x328   :  { %514 = vsyncpa [#allocation9 + $0x1], 1 }

</bundles_post_ra>
